<compile_context>
chip_gen: v7x
topology: tpu7x:2x2x1
jax: 0.10.0
libtpu: 0.0.40
codegen_flags: <defaults>
</compile_context>

<pallas_src>
import jax
import jax.numpy as jnp
from jax import lax
from jax.experimental import pallas as pl
from jax.experimental.pallas import tpu as pltpu

# VMEM budget for the double-buffered hidden-state tile (bytes). 32 MiB keeps
# total VMEM use well under v7x's 64 MiB/TC physical capacity.
_HIDDEN_TILE_BUDGET_BYTES = 32 * 1024 * 1024
_VMEM_LIMIT_BYTES = 48 * 1024 * 1024


def qa_head_kernel(x_ref, w_ref, b_ref, o_ref):
    """One grid step processes Bt batch elements.

    x_ref : (Bt, S, H)  backbone hidden states
    w_ref : (2, H)      nn.Linear weight (PyTorch [out, in] layout)
    b_ref : (2, 1)      nn.Linear bias (f32)
    o_ref : (Bt, 2, S)  channel-major per-sequence softmax output
    """
    w = w_ref[...].astype(x_ref.dtype)   # match activation dtype for the MXU
    bias = b_ref[...]                    # (2, 1) f32
    bt = x_ref.shape[0]
    for bi in range(bt):                 # static unroll; Bt is VMEM-bounded (small)
        x = x_ref[bi]                    # (S, H)
        # (2, H) x (S, H) contracted over H -> (2, S): sequence axis on lanes,
        # f32 accumulation on the MXU.
        logits = lax.dot_general(
            w, x,
            dimension_numbers=(((1,), (1,)), ((), ())),
            preferred_element_type=jnp.float32,
        ) + bias                         # (2, S) f32

        # Softmax over the sequence axis (lanes), independently per channel.
        m = jnp.max(logits, axis=-1, keepdims=True)   # (2, 1)
        e = jnp.exp(logits - m)                       # (2, S)
        s = jnp.sum(e, axis=-1, keepdims=True)        # (2, 1)
        # approx reciprocal -> EUP slot (free); tolerance loosened accordingly.
        o_ref[bi] = (e * pl.reciprocal(s, approx=True)).astype(o_ref.dtype)


def _pick_batch_tile(B, S, H, itemsize):
    """Largest Bt whose double-buffered hidden block fits the VMEM budget,
    keeping >= 2 grid steps (v7x megacore) and an even division of B."""
    bytes_per_batch = max(1, S * H * itemsize)
    bt = max(1, min(B, _HIDDEN_TILE_BUDGET_BYTES // (2 * bytes_per_batch)))
    if B >= 2:
        bt = min(bt, pl.cdiv(B, 2))      # keep at least two grid steps
    while B % bt:                        # avoid ragged last block
        bt -= 1
    return bt


def qa_model_forward(hidden, w, b):
    """hidden: [B, S, H]; w: [2, H] (nn.Linear weight layout); b: [2] -> [B, S, 2]."""
    B, S, H = hidden.shape
    bt = _pick_batch_tile(B, S, H, hidden.dtype.itemsize)
    grid = (B // bt,)
    b2 = jnp.asarray(b, jnp.float32).reshape(2, 1)

    out_cs = pl.pallas_call(
        qa_head_kernel,
        out_shape=jax.ShapeDtypeStruct((B, 2, S), hidden.dtype),
        grid_spec=pltpu.PrefetchScalarGridSpec(
            num_scalar_prefetch=0,
            grid=grid,
            in_specs=[
                pl.BlockSpec((bt, S, H), lambda i: (i, 0, 0)),
                pl.BlockSpec((2, H), lambda i: (0, 0)),
                pl.BlockSpec((2, 1), lambda i: (0, 0)),
            ],
            out_specs=pl.BlockSpec((bt, 2, S), lambda i: (i, 0, 0)),
        ),
        compiler_params=pltpu.CompilerParams(
            dimension_semantics=("parallel",),
            vmem_limit_bytes=_VMEM_LIMIT_BYTES,
        ),
    )(hidden, w, b2)

    # Tiny output transpose back to the module's [B, S, 2] layout.
    return jnp.transpose(out_cs, (0, 2, 1))


def reference_forward(hidden, w, b):
    logits = jnp.einsum("bsh,ch->bsc", hidden, w) + b
    return jax.nn.softmax(logits, axis=1)   # softmax over sequence dim per channel


if __name__ == "__main__":
    # Small shapes consistent with the module's forward: batch=2, seq=8, hidden=32.
    B, S, H = 2, 8, 32
    key = jax.random.PRNGKey(0)
    k_x, k_w, k_b = jax.random.split(key, 3)

    # Synthetic "last_hidden_state" standing in for the frozen backbone output.
    hidden = jax.random.normal(k_x, (B, S, H), dtype=jnp.float32)

    # Deterministic Linear(H, 2) parameters (nn.Linear layout: weight [2, H], bias [2]).
    bound = 1.0 / (H ** 0.5)
    w_pt = jax.random.uniform(k_w, (2, H), minval=-bound, maxval=bound, dtype=jnp.float32)
    b_pt = jax.random.uniform(k_b, (2,), minval=-bound, maxval=bound, dtype=jnp.float32)

    out = qa_model_forward(hidden, w_pt, b_pt)
    out = jax.block_until_ready(out)

    ref = reference_forward(hidden, w_pt, b_pt)
    assert out.shape == (B, S, 2)
    # Tolerance accounts for the approx (EUP) reciprocal in the softmax denominator.
    assert jnp.allclose(out, ref, atol=1e-3, rtol=1e-3), "mismatch vs reference"
    print("KERNEL_OK")
</pallas_src>

<mosaic_0001>
module attributes {stable_mosaic.version = 11 : i64} {
  func.func @qa_head_kernel(%arg0: i32, %arg1: memref<1x8x32xf32, #tpu.memory_space<vmem>>, %arg2: memref<2x32xf32, #tpu.memory_space<vmem>>, %arg3: memref<2x1xf32, #tpu.memory_space<vmem>>, %arg4: memref<1x2x8xf32, #tpu.memory_space<vmem>>) attributes {dimension_semantics = [#tpu.dimension_semantics<parallel>], iteration_bounds = array<i64: 2>, scalar_prefetch = 0 : i64, scratch_operands = 0 : i64, tpu.core_type = #tpu.core_type<tc>, window_params = [{transform_indices = @transform_0, window_bounds = array<i64: 1, 8, 32>}, {pipeline_mode = #tpu.pipeline_mode<synchronous>, transform_indices = @transform_1, window_bounds = array<i64: 2, 32>}, {pipeline_mode = #tpu.pipeline_mode<synchronous>, transform_indices = @transform_2, window_bounds = array<i64: 2, 1>}, {transform_indices = @transform_3, window_bounds = array<i64: 1, 2, 8>}]} {
    %c0 = arith.constant 0 : index
    %c0_0 = arith.constant 0 : index
    %0 = vector.load %arg2[%c0, %c0_0] : memref<2x32xf32, #tpu.memory_space<vmem>>, vector<2x32xf32>
    %c0_1 = arith.constant 0 : index
    %c0_2 = arith.constant 0 : index
    %1 = vector.load %arg3[%c0_1, %c0_2] : memref<2x1xf32, #tpu.memory_space<vmem>>, vector<2x1xf32>
    %c0_3 = arith.constant 0 : index
    %c0_4 = arith.constant 0 : index
    %c0_5 = arith.constant 0 : index
    %2 = vector.load %arg1[%c0_3, %c0_4, %c0_5] : memref<1x8x32xf32, #tpu.memory_space<vmem>>, vector<1x8x32xf32>
    %3 = vector.shape_cast %2 : vector<1x8x32xf32> to vector<8x32xf32>
    %cst = arith.constant dense<0.000000e+00> : vector<2x8xf32>
    %4 = tpu.matmul %0, %3, %cst {dimension_numbers = #tpu.dot_dimension_numbers<[1], [1], [0], [0], [0, 0, 1, 0], [], []>} : vector<2x32xf32>, vector<8x32xf32>, vector<2x8xf32> -> vector<2x8xf32>
    %5 = vector.broadcast %1 : vector<2x1xf32> to vector<2x8xf32>
    %6 = arith.addf %4, %5 : vector<2x8xf32>
    %cst_6 = arith.constant dense<0xFF800000> : vector<2xf32>
    %7 = vector.multi_reduction <maximumf>, %6, %cst_6 [1] : vector<2x8xf32> to vector<2xf32>
    %8 = vector.shape_cast %7 : vector<2xf32> to vector<2x1xf32>
    %9 = vector.broadcast %8 : vector<2x1xf32> to vector<2x8xf32>
    %10 = arith.subf %6, %9 : vector<2x8xf32>
    %11 = math.exp %10 : vector<2x8xf32>
    %cst_7 = arith.constant dense<0.000000e+00> : vector<2xf32>
    %12 = vector.multi_reduction <add>, %11, %cst_7 [1] : vector<2x8xf32> to vector<2xf32>
    %13 = vector.shape_cast %12 : vector<2xf32> to vector<2x1xf32>
    %14 = tpu.reciprocal %13 {approx = true} : vector<2x1xf32> -> vector<2x1xf32>
    %15 = vector.broadcast %14 : vector<2x1xf32> to vector<2x8xf32>
    %16 = arith.mulf %11, %15 : vector<2x8xf32>
    %c0_8 = arith.constant 0 : index
    %c0_9 = arith.constant 0 : index
    %c0_10 = arith.constant 0 : index
    %17 = vector.load %arg4[%c0_8, %c0_9, %c0_10] : memref<1x2x8xf32, #tpu.memory_space<vmem>>, vector<1x2x8xf32>
    %18 = vector.shape_cast %17 : vector<1x2x8xf32> to vector<2x8xf32>
    %19 = vector.shape_cast %16 : vector<2x8xf32> to vector<1x2x8xf32>
    tpu.vector_store %arg4[%c0_8, %c0_9, %c0_10], %19 {strides = array<i32>} : memref<1x2x8xf32, #tpu.memory_space<vmem>>, vector<1x2x8xf32>,
    return
  }
  func.func @transform_0(%arg0: i32) -> (i32, i32, i32) {
    %c0_i32 = arith.constant 0 : i32
    %c0_i32_0 = arith.constant 0 : i32
    %c0_i32_1 = arith.constant 0 : i32
    return %arg0, %c0_i32, %c0_i32_0 : i32, i32, i32
  }
  func.func @transform_1(%arg0: i32) -> (i32, i32) {
    %c0_i32 = arith.constant 0 : i32
    %c0_i32_0 = arith.constant 0 : i32
    %c0_i32_1 = arith.constant 0 : i32
    return %c0_i32, %c0_i32_0 : i32, i32
  }
  func.func @transform_2(%arg0: i32) -> (i32, i32) {
    %c0_i32 = arith.constant 0 : i32
    %c0_i32_0 = arith.constant 0 : i32
    %c0_i32_1 = arith.constant 0 : i32
    return %c0_i32, %c0_i32_0 : i32, i32
  }
  func.func @transform_3(%arg0: i32) -> (i32, i32, i32) {
    %c0_i32 = arith.constant 0 : i32
    %c0_i32_0 = arith.constant 0 : i32
    %c0_i32_1 = arith.constant 0 : i32
    return %arg0, %c0_i32, %c0_i32_0 : i32, i32, i32
  }
}

</mosaic_0001>

<bundles_post_ra>
// kernel: tpu_custom_call.1
= control target key start
LH: loop header
LB: loop body
LE: loop exit
PB: predicated region body
PF: predicated region fallthrough
CT: control target
= control target key end

     0   :  { %8 = vsyncpa [#allocation3], 0  ;;  %s737_s0 = inlined_call_operand.hbm [shape: f32[2,8,32], index: 0, kind: input, shape index: {}]   ;;  %s738_s1 = inlined_call_operand.vmem [shape: f32[2,32], index: 1, kind: input, shape index: {}]   ;;  %s739_s2 = inlined_call_operand.vmem [shape: f32[2,1], index: 2, kind: input, shape index: {}]   ;;  %s740_s3 = inlined_call_operand.hbm [shape: f32[2,2,8], index: 3, kind: output, shape index: {}]  }
   0x1   :  { %10 = vsyncpa [#allocation3 + $0x1], 0 }
   0x2   :  { %11 = vsyncpa [#allocation4], 0 }
   0x3   :  { %13 = vsyncpa [#allocation4 + $0x1], 0  ;;  %s566_s12 = smov 0   ;;  %s568_s13 = smov 0  }
   0x4   :  { %s570_s14 = smov 0   ;;  %s572_s15 = smov 0  }
   0x5 LB: > { %s587_s16 = sadd.s32 4294967295, %s539_s15   ;;  %s368_s17 = sadd.s32 4294967294, %s539_s15   ;;  %s539_s15 = sphi %s572_s15, %s755_s15   ;;  %s535_s14 = sphi %s570_s14, %s754_s14   ;;  %s531_s13 = sphi %s568_s13, %s753_s13   ;;  %s527_s12 = sphi %s566_s12, %s752_s12  }
   0x6   : > { %s591_s18 = sadd.s32 1, %s539_s15   ;;  %s26_s19 = sadd.s32 1, %s535_s14 }
   0x7   : > { %s23_s20 = ssub.s32 %s539_s15, %s591_s18  ;;  %p33_p0 = scmp.ne.s32.totalorder %s535_s14, %s531_s13 }
   0x8   : > { %p24_p1 = scmp.eq.s32.totalorder %s23_s20, 0  ;;  %p34_p2 = scmp.eq.s32.totalorder %s539_s15, 0 }
   0x9   : > { %p39_p3 = scmp.ne.s32.totalorder %s531_s13, %s527_s12  ;;  %p40_p4 = scmp.eq.s32.totalorder %s587_s16, 0 }
   0xa   : > { %s603_s21 = scalar_select %p24_p1, %s535_s14, %s26_s19  }
   0xb   : > { %p605_p5 = por %p34_p2, %p33_p0  ;;  %p609_p6 = por %p40_p4, %p39_p3 }
   0xc   : > { %p105_p7 = scmp.eq.s32.totalorder %s587_s16, 1  ;;  %p111_p8 = scmp.eq.s32.totalorder %s368_s17, 1 }
   0xd   : > { %p401_p10 = scmp.lt.s32.totalorder %s539_s15, 2  ;;  %s137_s26 = sand.u32 1, %s535_s14  }
   0xe   : > { %p616_p11 = por %p105_p7, %p33_p0  ;;  %p620_p12 = por %p111_p8, %p39_p3 }
   0xf   : > { %s372_s27 = sshll.u32 %s539_s15, 7  ;;  %s371_s28 = sshll.u32 %s137_s26, 3 }
  0x10   : > { %s744_s24 = scalar_select %p616_p11, 1, 0 }
  0x11   : > { %s745_s25 = scalar_select %p620_p12, 1, 0 }
  0x12   : > { %s629_s4 = scalar_lea.hbm %s737_s0, %s372_s27  ;;  %s141_s5 = scalar_lea.vmem [#allocation2], %s371_s28 }
  0x13   : > { %s148_s6 = sshll.u32 %s141_s5, 4  ;;  %p633_p13 = pnand %p401_p10, %p605_p5  ;;  %s637_s6 = int_to_ptr.vmem [resolvable:$true] %s148_s6 }
  0x14   : > { %s138_s8 = scalar_lea.sflag [#allocation3], %s137_s26  ;;  %s443_s9 = scalar_lea.hbm %s629_s4, 128 }
  0x15   : > { %p444_p2 = scmp.ne.s32.totalorder %s629_s4, %s443_s9  ;;  %p445_p3 = pneg %p633_p13 }
  0x16   : > { %s448_s17 = scalar_lea.hbm %s737_s0, 256  ;;  %p449_p5 = scmp.lt.u32.totalorder %s629_s4, %s737_s0 }
  0x17   : > { %p446_p4 = pnand %p445_p3, %p444_p2  ;;  %p450_p8 = scmp.lt.u32.totalorder %s448_s17, %s443_s9 }
  0x18   : > { %p452_p9 = scmp.lt.u32.totalorder %s443_s9, %s629_s4 }
  0x19   : > { %p447_p7 = pneg %p446_p4  ;;  %p451_p10 = por %p450_p8, %p449_p5 }
  0x1b   : > { %p453_p0 = por %p452_p9, %p451_p10 }
  0x1d   : > { %p454_p1 = pnand %p453_p0, %p447_p7 }
  0x1f   : > { %457 = shalt.err (!%p454_p1)
}
  0x20   : > { %s458_s22 = scalar_lea.vmem %s637_s6, 128  ;;  %s541_s26 = smov [#allocation2]  }
  0x21   : > { %p459_p2 = scmp.ne.s32.totalorder %s637_s6, %s458_s22  ;;  %s463_s27 = sshll.u32 %s541_s26, 4  ;;  %s464_s27 = int_to_ptr.vmem [resolvable:$false] %s463_s27 }
  0x22   : > { %s465_s28 = scalar_lea.vmem %s464_s27, 256  ;;  %p466_p11 = scmp.lt.s32.totalorder %s637_s6, %s464_s27 }
  0x23   : > { %p461_p4 = pnand %p459_p2, %p445_p3  ;;  %p467_p5 = scmp.lt.s32.totalorder %s465_s28, %s458_s22 }
  0x25   : > { %p462_p12 = pneg %p461_p4  ;;  %p468_p8 = por %p467_p5, %p466_p11 }
  0x27   : > { %p469_p9 = pnand %p468_p8, %p462_p12 }
  0x29   : > { %472 = shalt.err (!%p469_p9)
}
  0x2a   : > { %396 = dma.hbm_to_vmem [thread:$0]  (!%p633_p13), %s629_s4, 128, %s637_s6, %s138_s8  }
  0x2b   : > { %p747_p0 = scmp.lt.s32.totalorder %s539_s15, 3  ;;  %p748_p1 = scmp.ge.s32.totalorder %s539_s15, 1 }
  0x2d   : > { %p154_p3 = pnand %p748_p1, %p747_p0 }
  0x2e   : > { %s671_s29 = sand.u32 (!%p154_p3), 1, %s531_s13  }
  0x2f   : > { %157 = sbr.rel (%p154_p3) target bundleno = 602 (0x25a), region = 32  ;;  %s374_s30 = sshll.u32 (!%p154_p3), %s671_s29, 3 }
  0x30   : > { %s160_s5 = scalar_lea.sflag (!%p154_p3), [#allocation3], %s671_s29  ;;  %s163_s9 = scalar_lea.vmem (!%p154_p3), [#allocation2], %s374_s30 }
  0x36   : > { %518 = dma.done.wait (%p609_p6), %s160_s5, 128  }
  0x37   : > { %520 = vsyncadd (%p609_p6), %s160_s5, 4294967168  ;;  %v542_v0 = vmov 0.0   ;;  %vm543_vm0 = vmmov 0   ;;  %v544_v1 = vmov 0   ;;  %vm194_vm1 = vcmask 261120   ;;  %v188_v2 = vld [vmem:[%s163_s9] sm:$0xff] }
  0x38   : > { %384 = vmatprep.subr.mxu0 %v542_v0  ;;  %386 = vmatprep.mubr.msk.f32.mxu0 %vm543_vm0, %v542_v0  ;;  %v187_v3 = vld [vmem:[%s739_s2] sm:$0x3]  ;;  %vm271_vm2 = vcmask 58368   ;;  %s375_s23 = sshll.u32 %s671_s29, 1  ;;  %s379_s10 = sshll.u32 %s587_s16, 5 }
  0x39   : > { %438 = vset.pattern.permute.xlu0 %v544_v1  ;;  %385 = vmatpush3.xpose.msk.msra.mxu0 %vm194_vm1, %v188_v2  ;;  %v186_v4 = vld [vmem:[%s738_s1] sm:$0x3]  ;;  %s185_s11 = scalar_lea.vmem [#allocation5], %s375_s23  ;;  %s692_s22 = scalar_lea.hbm %s740_s3, %s379_s10 }
  0x3a   : > { %191 = vperm.xlu0 %438, %v187_v3   ;;  %s298_s17 = sshll.u32 %s185_s11, 4  ;;  %s285_s26 = scalar_lea.sflag [#allocation4], %s671_s29  ;;  %s694_s17 = int_to_ptr.vmem [resolvable:$true] %s298_s17 }
  0x3b   : > { %s473_s27 = scalar_lea.vmem %s694_s17, 32  ;;  %p749_p11 = scmp.ne.s32.totalorder %s744_s24, 0 }
  0x3c   : > { %387 = vmatmul.mubr.msk.f32.vlgmr.msra.gmra.mrb[0].mxu0 %vm194_vm1, %v186_v4  ;;  %p474_p6 = scmp.ne.s32.totalorder %s694_s17, %s473_s27  ;;  %s545_s16 = smov [#allocation5]  }
  0x3d   : > { %s477_s28 = sshll.u32 %s545_s16, 4  ;;  %s478_s28 = int_to_ptr.vmem [resolvable:$false] %s477_s28 }
  0x3e   : > { %p475_p12 = pnand %p474_p6, %p749_p11  ;;  %s479_s30 = scalar_lea.vmem %s478_s28, 64 }
  0x3f   : > { %p480_p7 = scmp.lt.s32.totalorder %s694_s17, %s478_s28  ;;  %p481_p10 = scmp.lt.s32.totalorder %s479_s30, %s473_s27 }
  0x40   : > { %p476_p13 = pneg %p475_p12 }
  0x41   : > { %p482_p2 = por %p481_p10, %p480_p7 }
  0x43   : > { %p483_p4 = pnand %p482_p2, %p476_p13 }
  0xb9   : > { %v192_v5 = vpop.permute.xlu0 %191 }
 0x10f   : > { %v267_v6 = vpop.f32.mrb[0].mxu0 }
 0x110   : > { %v268_v7 = vadd.f32 %v267_v6, %v192_v5  ;;  %v388_v8 = vpop.f32.mrb[1].mxu0 }
 0x112   : > { %v272_v9 = vsel %vm271_vm2, %v268_v7, -inf }
 0x113   : > { %273 = vmax.xlane.f32.xlu0 %v272_v9 }
 0x1a0   : > { %v274_v10 = vpop.xlane.xlu0 %273 }
 0x1a1   : > { %v275_v11 = vsub.f32 %v268_v7, %v274_v10 }
 0x1a3   : > { %v276_v12 = vmul.f32 1.442695, %v275_v11 }
 0x1a5   : > { %439 = vpow2.f32 %v276_v12 }
 0x1af   : > { %v440_v13 = vpop.eup %439 }
 0x1b0   : > { %v278_v14 = vsel %vm271_vm2, %v440_v13, 0.0 }
 0x1b1   : > { %279 = vadd.xlane.f32.xlu1 %v278_v14 }
 0x23e   : > { %v280_v15 = vpop.xlane.xlu1 %279 }
 0x23f   : > { %441 = vrcp.f32 %v280_v15 }
 0x249   : > { %v442_v16 = vpop.eup %441 }
 0x24a   : > { %v282_v17 = vmul.f32 %v442_v16, %v440_v13 }
 0x24c   : > { %283 = vst.msk [vmem:[%s185_s11] sm:$0x3] %vm271_vm2, %v282_v17 }
 0x24d   : > { %486 = shalt.err (!%p483_p4)
}
 0x24e   : > { %s487_s29 = scalar_lea.hbm %s692_s22, 32  ;;  %s491_s4 = scalar_lea.hbm %s740_s3, 64 }
 0x24f   : > { %p488_p5 = scmp.ne.s32.totalorder %s692_s22, %s487_s29  ;;  %p492_p0 = scmp.lt.u32.totalorder %s692_s22, %s740_s3 }
 0x250   : > { %p493_p1 = scmp.lt.u32.totalorder %s491_s4, %s487_s29  ;;  %p495_p6 = scmp.lt.u32.totalorder %s487_s29, %s692_s22 }
 0x251   : > { %p489_p8 = pnand %p488_p5, %p749_p11 }
 0x252   : > { %p494_p3 = por %p493_p1, %p492_p0 }
 0x253   : > { %p490_p9 = pneg %p489_p8 }
 0x254   : > { %p496_p12 = por %p495_p6, %p494_p3 }
 0x256   : > { %p497_p13 = pnand %p496_p12, %p490_p9 }
 0x258   : > { %500 = shalt.err (!%p497_p13)
}
 0x259   : > { %391 = dma.vmem_to_hbm [thread:$0]  (%p749_p11), %s694_s17, 32, %s692_s22, %s285_s26  }
 0x25a PF: > { %s310_s8 = sand.u32 1, %s527_s12   ;;  %p750_p7 = scmp.ne.s32.totalorder %s745_s25, 0 }
 0x25b   : > { %p751_p10 = scmp.ge.s32.totalorder %s539_s15, 2  ;;  %s311_s23 = scalar_lea.sflag [#allocation4], %s310_s8 }
 0x25d   : > { %p398_p2 = pnand %p751_p10, %p750_p7 }
 0x25f   : > { %522 = dma.done.wait (!%p398_p2), %s311_s23, 32  }
 0x260   : > { %524 = vsyncadd (!%p398_p2), %s311_s23, 4294967264  ;;  %p16_p4 = scmp.ge.s32.totalorder %s591_s18, 4   ;;  %s752_s12 = smov %s531_s13 }
 0x261   : > { %s753_s13 = smov %s535_s14  ;;  %s754_s14 = smov %s603_s21 }
 0x262   : > { %s755_s15 = smov %s591_s18  ;;  %18 = sbr.rel (!%p16_p4) target bundleno = 5 (0x5), region = 77 }
 0x269   :  { %316 = vsyncpa [#allocation3], 1 }
 0x26a   :  { %318 = vsyncpa [#allocation3 + $0x1], 1 }
 0x26b   :  { %319 = vsyncpa [#allocation4], 1 }
 0x26c   :  { %321 = vsyncpa [#allocation4 + $0x1], 1 }

</bundles_post_ra>
